<compile_context>
chip_gen: v7x
topology: tpu7x:2x2x1
jax: 0.10.0
libtpu: 0.0.40
codegen_flags: <defaults>
</compile_context>

<pallas_src>
import functools

import jax
import jax.numpy as jnp
from jax.experimental import pallas as pl
from jax.experimental.pallas import tpu as pltpu


def _ce2d_kernel(logits_ref, target_ref, out_ref, *, num_classes, ignore_label,
                 num_rows, tile_h, mask_rows):
    """One (batch, h-tile) grid step.

    logits_ref: (1, C, TH, W)  source dtype (f32 or bf16) -- native NCHW tile
    target_ref: (1, TH, W)     integer labels
    out_ref:    (1, 1, 1, W)   float32 per-(batch, h-tile) lane partial sums
    """
    tgt = target_ref[0].astype(jnp.int32)                      # (TH, W)

    valid = (tgt >= 0) & (tgt != ignore_label)                 # (TH, W)
    if mask_rows:
        # Ragged tail of the h axis: rows >= num_rows are past-the-end HBM
        # garbage for both logits and targets -> mask them out.
        j = pl.program_id(1)
        row = j * tile_h + jax.lax.broadcasted_iota(jnp.int32, tgt.shape, 0)
        valid = valid & (row < num_rows)

    # NOTE: valid labels are assumed to satisfy 0 <= label < C.  PyTorch's
    # F.cross_entropy raises for out-of-range labels; here such labels would
    # silently contribute logsumexp (picked logit = 0).
    tgt_safe = jnp.where(valid, tgt, 0)

    # bf16 inputs: keep the per-element math in bf16 (v6e/v7x VPU/EUP are
    # bf16-capable -> ~2x packed throughput); accumulate in f32.
    compute_dtype = (jnp.bfloat16 if logits_ref.dtype == jnp.bfloat16
                     else jnp.float32)

    def slab(k):
        return logits_ref[0, k].astype(compute_dtype)          # (TH, W)

    # TODO(synk): for very large class counts (c >> 256) this unrolled class
    # loop should become a lax.fori_loop to bound code size.
    # Pass 1: per-pixel max over classes (numerical stabilization).
    m = slab(0)
    for k in range(1, num_classes):
        m = jnp.maximum(m, slab(k))

    # Pass 2: exp-sum over classes + target-logit pick (one-hot select),
    # both accumulated in f32.
    denom = jnp.zeros(tgt.shape, jnp.float32)
    picked = jnp.zeros(tgt.shape, jnp.float32)
    for k in range(num_classes):
        xk = slab(k)
        denom = denom + jnp.exp(xk - m).astype(jnp.float32)
        picked = picked + jnp.where(tgt_safe == k, xk, 0).astype(jnp.float32)

    lse = jnp.log(denom) + m.astype(jnp.float32)               # (TH, W)
    per_pixel = jnp.where(valid, lse - picked, 0.0)            # -log p[target]

    # Collapse the row (sublane) axis; lanes (w) stay dense for the store.
    out_ref[0, 0] = jnp.sum(per_pixel, axis=0, keepdims=True)  # (1, W)


def cross_entropy_2d(predict, target, *, ignore_label=255, size_average=True,
                     block_budget_bytes=10 * 1024 * 1024):
    """predict: (n, c, h, w) float; target: (n, h, w) int. Returns scalar loss."""
    # TODO(synk): optional per-class `weight` rescaling not implemented
    # (module default is weight=None).
    n, c, h, w = predict.shape
    assert target.shape == (n, h, w), (target.shape, (n, h, w))

    # Keep the target in its (cheap) integer dtype; widen inside the kernel.
    tgt = target if jnp.issubdtype(target.dtype, jnp.integer) \
        else target.astype(jnp.int32)

    logit_bytes = predict.dtype.itemsize
    tgt_bytes = tgt.dtype.itemsize

    # h-tile selection: one (logits + target) block ~= block_budget_bytes
    # (double-buffered by Pallas), TH a multiple of 8 (or full h).
    row_bytes = c * w * logit_bytes + w * tgt_bytes
    rows_fit = max(1, block_budget_bytes // row_bytes)
    if rows_fit >= h or h <= 8:
        th = h
    else:
        th = min(h, max(8, (rows_fit // 8) * 8))
    num_j = pl.cdiv(h, th)
    mask_rows = (h % th) != 0

    block_vmem = c * th * w * logit_bytes + th * w * tgt_bytes
    vmem_limit = max(32 * 1024 * 1024, 2 * block_vmem + (2 << 20))

    kernel = functools.partial(
        _ce2d_kernel, num_classes=c, ignore_label=ignore_label,
        num_rows=h, tile_h=th, mask_rows=mask_rows)

    partials = pl.pallas_call(
        kernel,
        out_shape=jax.ShapeDtypeStruct((n, num_j, 1, w), jnp.float32),
        grid_spec=pltpu.PrefetchScalarGridSpec(
            num_scalar_prefetch=0,
            grid=(n, num_j),
            in_specs=[
                # Logits in native NCHW layout: full class axis, TH rows, all w.
                pl.BlockSpec((1, c, th, w), lambda b, j: (b, 0, j, 0)),
                pl.BlockSpec((1, th, w), lambda b, j: (b, j, 0)),
            ],
            # Each step owns its own lane-dense partial -> no reduction axis.
            out_specs=pl.BlockSpec((1, 1, 1, w), lambda b, j: (b, j, 0, 0)),
        ),
        compiler_params=pltpu.CompilerParams(
            # Fully parallel grid: batch AND h-tiles can be split across
            # TensorCores (v7x megacore); no-op on single-TC v5e/v6e.
            dimension_semantics=("parallel", "parallel"),
            vmem_limit_bytes=vmem_limit,
        ),
        cost_estimate=pl.CostEstimate(
            flops=6 * n * c * h * w,
            transcendentals=n * c * h * w,
            bytes_accessed=(n * c * h * w * logit_bytes
                            + n * h * w * tgt_bytes
                            + n * num_j * w * 4),
        ),
    )(predict, tgt)

    total = jnp.sum(partials)
    # Exact valid-pixel count from the (1/c-sized) target stream.
    count = jnp.sum((target >= 0) & (target != ignore_label))
    if size_average:
        # All-ignored batch -> 0 (matches the module's torch.zeros(1) path).
        loss = jnp.where(count > 0,
                         total / jnp.maximum(count.astype(jnp.float32), 1.0),
                         0.0)
    else:
        loss = total
    return loss


def _reference_loss(predict, target, ignore_label=255, size_average=True):
    """Plain-JAX reference of the PyTorch forward."""
    n, c, h, w = predict.shape
    logits = jnp.transpose(predict, (0, 2, 3, 1)).reshape(-1, c).astype(jnp.float32)
    tgt = target.reshape(-1).astype(jnp.int32)
    valid = (tgt >= 0) & (tgt != ignore_label)
    logp = jax.nn.log_softmax(logits, axis=-1)
    nll = -jnp.take_along_axis(
        logp, jnp.where(valid, tgt, 0)[:, None], axis=-1)[:, 0]
    nll = jnp.where(valid, nll, 0.0)
    cnt = jnp.sum(valid)
    total = jnp.sum(nll)
    if size_average:
        return jnp.where(cnt > 0, total / jnp.maximum(cnt, 1), 0.0)
    return total


if __name__ == "__main__":
    key = jax.random.PRNGKey(0)
    k1, k2, k3, k4, k5, k6 = jax.random.split(key, 6)

    # --- base f32 test: module-sized shapes (n=2, c=4, h=w=16) ---
    n, c, h, w = 2, 4, 16, 16
    predict = jax.random.normal(k1, (n, c, h, w), dtype=jnp.float32)
    target = jax.random.randint(k2, (n, h, w), 0, c, dtype=jnp.int32)
    ignore_mask = jax.random.bernoulli(k3, p=0.2, shape=(n, h, w))
    target = jnp.where(ignore_mask, 255, target)

    loss = jax.block_until_ready(cross_entropy_2d(predict, target))
    ref = jax.block_until_ready(_reference_loss(predict, target))
    assert jnp.allclose(loss, ref, atol=1e-5, rtol=1e-5), (loss, ref)

    # --- tiled + ragged-tail test (forces TH=16 < h=24, h % TH != 0) ---
    n2, c2, h2, w2 = 2, 5, 24, 128
    predict2 = jax.random.normal(k4, (n2, c2, h2, w2), dtype=jnp.float32)
    target2 = jax.random.randint(k5, (n2, h2, w2), -1, c2, dtype=jnp.int32)
    ignore2 = jax.random.bernoulli(k6, p=0.1, shape=(n2, h2, w2))
    target2 = jnp.where(ignore2, 255, target2)
    small_budget = 16 * (c2 * w2 * 4 + w2 * 4)   # fit exactly 16 rows
    loss2 = jax.block_until_ready(
        cross_entropy_2d(predict2, target2, block_budget_bytes=small_budget))
    ref2 = jax.block_until_ready(_reference_loss(predict2, target2))
    assert jnp.allclose(loss2, ref2, atol=1e-5, rtol=1e-5), (loss2, ref2)

    # sum-reduction (size_average=False) path
    loss2s = jax.block_until_ready(
        cross_entropy_2d(predict2, target2, size_average=False,
                         block_budget_bytes=small_budget))
    ref2s = jax.block_until_ready(
        _reference_loss(predict2, target2, size_average=False))
    assert jnp.allclose(loss2s, ref2s, atol=1e-2, rtol=1e-5), (loss2s, ref2s)

    # --- bf16 logits: bf16 in-kernel math, f32 accumulation ---
    predict_bf16 = predict.astype(jnp.bfloat16)
    loss3 = jax.block_until_ready(cross_entropy_2d(predict_bf16, target))
    ref3 = jax.block_until_ready(
        _reference_loss(predict_bf16.astype(jnp.float32), target))
    assert jnp.allclose(loss3, ref3, atol=3e-2, rtol=3e-2), (loss3, ref3)

    print("KERNEL_OK")
</pallas_src>

<mosaic_0001>
module attributes {stable_mosaic.version = 11 : i64} {
  func.func @_ce2d_kernel(%arg0: i32, %arg1: i32, %arg2: memref<1x4x16x16xf32, #tpu.memory_space<vmem>>, %arg3: memref<1x16x16xi32, #tpu.memory_space<vmem>>, %arg4: memref<1x1x1x16xf32, #tpu.memory_space<vmem>>) attributes {dimension_semantics = [#tpu.dimension_semantics<parallel>, #tpu.dimension_semantics<parallel>], iteration_bounds = array<i64: 2, 1>, scalar_prefetch = 0 : i64, scratch_operands = 0 : i64, tpu.core_type = #tpu.core_type<tc>, window_params = [{transform_indices = @transform_0, window_bounds = array<i64: 1, 4, 16, 16>}, {transform_indices = @transform_1, window_bounds = array<i64: 1, 16, 16>}, {transform_indices = @transform_2, window_bounds = array<i64: 1, 1, 1, 16>}]} {
    %c0 = arith.constant 0 : index
    %c0_0 = arith.constant 0 : index
    %c0_1 = arith.constant 0 : index
    %0 = vector.load %arg3[%c0, %c0_0, %c0_1] : memref<1x16x16xi32, #tpu.memory_space<vmem>>, vector<1x16x16xi32>
    %1 = vector.shape_cast %0 : vector<1x16x16xi32> to vector<16x16xi32>
    %c0_i32 = arith.constant 0 : i32
    %2 = vector.broadcast %c0_i32 : i32 to vector<16x16xi32>
    %3 = arith.cmpi sge, %1, %2 : vector<16x16xi32>
    %c255_i32 = arith.constant 255 : i32
    %4 = vector.broadcast %c255_i32 : i32 to vector<16x16xi32>
    %5 = arith.cmpi ne, %1, %4 : vector<16x16xi32>
    %6 = arith.andi %3, %5 : vector<16x16xi1>
    %c0_i32_2 = arith.constant 0 : i32
    %7 = vector.broadcast %c0_i32_2 : i32 to vector<16x16xi32>
    %8 = arith.select %6, %1, %7 : vector<16x16xi1>, vector<16x16xi32>
    %c0_3 = arith.constant 0 : index
    %c0_4 = arith.constant 0 : index
    %c0_5 = arith.constant 0 : index
    %c0_6 = arith.constant 0 : index
    %9 = vector.load %arg2[%c0_3, %c0_4, %c0_5, %c0_6] : memref<1x4x16x16xf32, #tpu.memory_space<vmem>>, vector<1x1x16x16xf32>
    %10 = vector.shape_cast %9 : vector<1x1x16x16xf32> to vector<16x16xf32>
    %c0_7 = arith.constant 0 : index
    %c1 = arith.constant 1 : index
    %c0_8 = arith.constant 0 : index
    %c0_9 = arith.constant 0 : index
    %11 = vector.load %arg2[%c0_7, %c1, %c0_8, %c0_9] : memref<1x4x16x16xf32, #tpu.memory_space<vmem>>, vector<1x1x16x16xf32>
    %12 = vector.shape_cast %11 : vector<1x1x16x16xf32> to vector<16x16xf32>
    %13 = arith.maximumf %10, %12 : vector<16x16xf32>
    %c0_10 = arith.constant 0 : index
    %c2 = arith.constant 2 : index
    %c0_11 = arith.constant 0 : index
    %c0_12 = arith.constant 0 : index
    %14 = vector.load %arg2[%c0_10, %c2, %c0_11, %c0_12] : memref<1x4x16x16xf32, #tpu.memory_space<vmem>>, vector<1x1x16x16xf32>
    %15 = vector.shape_cast %14 : vector<1x1x16x16xf32> to vector<16x16xf32>
    %16 = arith.maximumf %13, %15 : vector<16x16xf32>
    %c0_13 = arith.constant 0 : index
    %c3 = arith.constant 3 : index
    %c0_14 = arith.constant 0 : index
    %c0_15 = arith.constant 0 : index
    %17 = vector.load %arg2[%c0_13, %c3, %c0_14, %c0_15] : memref<1x4x16x16xf32, #tpu.memory_space<vmem>>, vector<1x1x16x16xf32>
    %18 = vector.shape_cast %17 : vector<1x1x16x16xf32> to vector<16x16xf32>
    %19 = arith.maximumf %16, %18 : vector<16x16xf32>
    %cst = arith.constant 0.000000e+00 : f32
    %20 = vector.broadcast %cst : f32 to vector<16x16xf32>
    %cst_16 = arith.constant 0.000000e+00 : f32
    %21 = vector.broadcast %cst_16 : f32 to vector<16x16xf32>
    %c0_17 = arith.constant 0 : index
    %c0_18 = arith.constant 0 : index
    %c0_19 = arith.constant 0 : index
    %c0_20 = arith.constant 0 : index
    %22 = vector.load %arg2[%c0_17, %c0_18, %c0_19, %c0_20] : memref<1x4x16x16xf32, #tpu.memory_space<vmem>>, vector<1x1x16x16xf32>
    %23 = vector.shape_cast %22 : vector<1x1x16x16xf32> to vector<16x16xf32>
    %24 = arith.subf %23, %19 : vector<16x16xf32>
    %25 = math.exp %24 : vector<16x16xf32>
    %26 = arith.addf %20, %25 : vector<16x16xf32>
    %c0_i32_21 = arith.constant 0 : i32
    %27 = vector.broadcast %c0_i32_21 : i32 to vector<16x16xi32>
    %28 = arith.cmpi eq, %8, %27 : vector<16x16xi32>
    %c0_i32_22 = arith.constant 0 : i32
    %29 = arith.sitofp %c0_i32_22 : i32 to f32
    %30 = vector.broadcast %29 : f32 to vector<16x16xf32>
    %31 = arith.select %28, %23, %30 : vector<16x16xi1>, vector<16x16xf32>
    %32 = arith.addf %21, %31 : vector<16x16xf32>
    %c0_23 = arith.constant 0 : index
    %c1_24 = arith.constant 1 : index
    %c0_25 = arith.constant 0 : index
    %c0_26 = arith.constant 0 : index
    %33 = vector.load %arg2[%c0_23, %c1_24, %c0_25, %c0_26] : memref<1x4x16x16xf32, #tpu.memory_space<vmem>>, vector<1x1x16x16xf32>
    %34 = vector.shape_cast %33 : vector<1x1x16x16xf32> to vector<16x16xf32>
    %35 = arith.subf %34, %19 : vector<16x16xf32>
    %36 = math.exp %35 : vector<16x16xf32>
    %37 = arith.addf %26, %36 : vector<16x16xf32>
    %c1_i32 = arith.constant 1 : i32
    %38 = vector.broadcast %c1_i32 : i32 to vector<16x16xi32>
    %39 = arith.cmpi eq, %8, %38 : vector<16x16xi32>
    %c0_i32_27 = arith.constant 0 : i32
    %40 = arith.sitofp %c0_i32_27 : i32 to f32
    %41 = vector.broadcast %40 : f32 to vector<16x16xf32>
    %42 = arith.select %39, %34, %41 : vector<16x16xi1>, vector<16x16xf32>
    %43 = arith.addf %32, %42 : vector<16x16xf32>
    %c0_28 = arith.constant 0 : index
    %c2_29 = arith.constant 2 : index
    %c0_30 = arith.constant 0 : index
    %c0_31 = arith.constant 0 : index
    %44 = vector.load %arg2[%c0_28, %c2_29, %c0_30, %c0_31] : memref<1x4x16x16xf32, #tpu.memory_space<vmem>>, vector<1x1x16x16xf32>
    %45 = vector.shape_cast %44 : vector<1x1x16x16xf32> to vector<16x16xf32>
    %46 = arith.subf %45, %19 : vector<16x16xf32>
    %47 = math.exp %46 : vector<16x16xf32>
    %48 = arith.addf %37, %47 : vector<16x16xf32>
    %c2_i32 = arith.constant 2 : i32
    %49 = vector.broadcast %c2_i32 : i32 to vector<16x16xi32>
    %50 = arith.cmpi eq, %8, %49 : vector<16x16xi32>
    %c0_i32_32 = arith.constant 0 : i32
    %51 = arith.sitofp %c0_i32_32 : i32 to f32
    %52 = vector.broadcast %51 : f32 to vector<16x16xf32>
    %53 = arith.select %50, %45, %52 : vector<16x16xi1>, vector<16x16xf32>
    %54 = arith.addf %43, %53 : vector<16x16xf32>
    %c0_33 = arith.constant 0 : index
    %c3_34 = arith.constant 3 : index
    %c0_35 = arith.constant 0 : index
    %c0_36 = arith.constant 0 : index
    %55 = vector.load %arg2[%c0_33, %c3_34, %c0_35, %c0_36] : memref<1x4x16x16xf32, #tpu.memory_space<vmem>>, vector<1x1x16x16xf32>
    %56 = vector.shape_cast %55 : vector<1x1x16x16xf32> to vector<16x16xf32>
    %57 = arith.subf %56, %19 : vector<16x16xf32>
    %58 = math.exp %57 : vector<16x16xf32>
    %59 = arith.addf %48, %58 : vector<16x16xf32>
    %c3_i32 = arith.constant 3 : i32
    %60 = vector.broadcast %c3_i32 : i32 to vector<16x16xi32>
    %61 = arith.cmpi eq, %8, %60 : vector<16x16xi32>
    %c0_i32_37 = arith.constant 0 : i32
    %62 = arith.sitofp %c0_i32_37 : i32 to f32
    %63 = vector.broadcast %62 : f32 to vector<16x16xf32>
    %64 = arith.select %61, %56, %63 : vector<16x16xi1>, vector<16x16xf32>
    %65 = arith.addf %54, %64 : vector<16x16xf32>
    %66 = math.log %59 : vector<16x16xf32>
    %67 = arith.addf %66, %19 : vector<16x16xf32>
    %68 = arith.subf %67, %65 : vector<16x16xf32>
    %cst_38 = arith.constant 0.000000e+00 : f32
    %69 = vector.broadcast %cst_38 : f32 to vector<16x16xf32>
    %70 = arith.select %6, %68, %69 : vector<16x16xi1>, vector<16x16xf32>
    %cst_39 = arith.constant dense<0.000000e+00> : vector<16xf32>
    %71 = vector.multi_reduction <add>, %70, %cst_39 [0] : vector<16x16xf32> to vector<16xf32>
    %72 = vector.shape_cast %71 : vector<16xf32> to vector<1x16xf32>
    %c0_40 = arith.constant 0 : index
    %c0_41 = arith.constant 0 : index
    %c0_42 = arith.constant 0 : index
    %c0_43 = arith.constant 0 : index
    %73 = vector.load %arg4[%c0_40, %c0_41, %c0_42, %c0_43] : memref<1x1x1x16xf32, #tpu.memory_space<vmem>>, vector<1x1x1x16xf32>
    %74 = vector.shape_cast %73 : vector<1x1x1x16xf32> to vector<1x16xf32>
    %75 = vector.shape_cast %72 : vector<1x16xf32> to vector<1x1x1x16xf32>
    tpu.vector_store %arg4[%c0_40, %c0_41, %c0_42, %c0_43], %75 {strides = array<i32>} : memref<1x1x1x16xf32, #tpu.memory_space<vmem>>, vector<1x1x1x16xf32>,
    return
  }
  func.func @transform_0(%arg0: i32, %arg1: i32) -> (i32, i32, i32, i32) {
    %c0_i32 = arith.constant 0 : i32
    %c0_i32_0 = arith.constant 0 : i32
    %c0_i32_1 = arith.constant 0 : i32
    return %arg0, %c0_i32, %arg1, %c0_i32_0 : i32, i32, i32, i32
  }
  func.func @transform_1(%arg0: i32, %arg1: i32) -> (i32, i32, i32) {
    %c0_i32 = arith.constant 0 : i32
    %c0_i32_0 = arith.constant 0 : i32
    return %arg0, %arg1, %c0_i32 : i32, i32, i32
  }
  func.func @transform_2(%arg0: i32, %arg1: i32) -> (i32, i32, i32, i32) {
    %c0_i32 = arith.constant 0 : i32
    %c0_i32_0 = arith.constant 0 : i32
    %c0_i32_1 = arith.constant 0 : i32
    return %arg0, %arg1, %c0_i32, %c0_i32_0 : i32, i32, i32, i32
  }
}

</mosaic_0001>

<bundles_post_ra>
// kernel: tpu_custom_call.1
= control target key start
LH: loop header
LB: loop body
LE: loop exit
PB: predicated region body
PF: predicated region fallthrough
CT: control target
= control target key end

     0   :  { %7 = vsyncpa [#allocation3], 0  ;;  %s1033_s0 = inlined_call_operand.hbm [shape: f32[2,4,16,16], index: 0, kind: input, shape index: {}]   ;;  %s1034_s1 = inlined_call_operand.hbm [shape: s32[2,16,16], index: 1, kind: input, shape index: {}]   ;;  %s1035_s2 = inlined_call_operand.hbm [shape: f32[2,1,1,16], index: 2, kind: output, shape index: {}]  }
   0x1   :  { %9 = vsyncpa [#allocation3 + $0x1], 0 }
   0x2   :  { %10 = vsyncpa [#allocation6], 0 }
   0x3   :  { %12 = vsyncpa [#allocation6 + $0x1], 0 }
   0x4   :  { %13 = vsyncpa [#allocation4], 0 }
   0x5   :  { %15 = vsyncpa [#allocation4 + $0x1], 0  ;;  %s729_s9 = smov 0   ;;  %s731_s10 = smov 0  }
   0x6   :  { %s733_s11 = smov 0   ;;  %s735_s12 = smov 0  }
   0x7   :  { %s737_s13 = smov 0   ;;  %s739_s14 = smov 0  }
   0x8 LB: > { %s448_s15 = sadd.s32 4294967295, %s707_s14   ;;  %s449_s16 = sadd.s32 4294967294, %s707_s14   ;;  %s707_s14 = sphi %s739_s14, %s21_s14   ;;  %s703_s13 = sphi %s737_s13, %s1057_s13   ;;  %s699_s12 = sphi %s735_s12, %s1056_s12   ;;  %s695_s11 = sphi %s733_s11, %s1055_s11   ;;  %s691_s10 = sphi %s731_s10, %s1054_s10   ;;  %s687_s9 = sphi %s729_s9, %s1053_s9  }
   0x9   : > { %s33_s17 = sadd.s32 1, %s703_s13  ;;  %s42_s18 = sadd.s32 1, %s695_s11 }
   0xa   : > { %p35_p0 = scmp.ge.s32.totalorder %s33_s17, 2  ;;  %p49_p1 = scmp.ne.s32.totalorder %s695_s11, %s691_s10 }
   0xb   : > { %p50_p2 = scmp.eq.s32.totalorder %s707_s14, 0  ;;  %p55_p3 = scmp.ne.s32.totalorder %s691_s10, %s687_s9 }
   0xc   : > { %s1059_s17 = smov (%p35_p0, %s33_s17), 0  ;;  %p56_p5 = scmp.eq.s32.totalorder %s448_s15, 0 }
   0xd   : > { %p770_p4 = por %p50_p2, %p49_p1  ;;  %s37_s20 = ssub.s32 %s703_s13, %s1059_s17 }
   0xe   : > { %p109_p6 = scmp.eq.s32.totalorder %s448_s15, 1  ;;  %p40_p7 = scmp.eq.s32.totalorder %s37_s20, 0 }
   0xf   : > { %p776_p8 = por %p56_p5, %p55_p3  ;;  %p115_p10 = scmp.eq.s32.totalorder %s449_s16, 1 }
  0x10   : > { %p780_p9 = por %p109_p6, %p49_p1  ;;  %p489_p13 = scmp.lt.s32.totalorder %s707_s14, 2 }
  0x11   : > { %s1039_s21 = scalar_select %p776_p8, 1, 0 }
  0x12   : > { %s1040_s22 = scalar_select %p780_p9, 1, 0 }
  0x13   : > { %s785_s23 = scalar_select %p40_p7, %s695_s11, %s42_s18  }
  0x14   : > { %p787_p11 = por %p115_p10, %p55_p3  ;;  %s794_s25 = sand.u32 1, %s695_s11  }
  0x15   : > { %s452_s26 = sshll.u32 %s794_s25, 6  ;;  %s470_s27 = sshll.u32 %s703_s13, 10 }
  0x16   : > { %s1041_s24 = scalar_select %p787_p11, 1, 0 }
  0x17   : > { %s801_s30 = scalar_lea.hbm %s1033_s0, %s470_s27  ;;  %s139_s3 = scalar_lea.vmem [#allocation2], %s452_s26 }
  0x18   : > { %s148_s4 = sshll.u32 %s139_s3, 4  ;;  %p807_p0 = pnand %p489_p13, %p770_p4  ;;  %s803_s4 = int_to_ptr.vmem [resolvable:$true] %s148_s4 }
  0x19   : > { %s136_s6 = scalar_lea.sflag [#allocation3], %s794_s25  ;;  %s561_s7 = scalar_lea.hbm %s801_s30, 1024 }
  0x1a   : > { %p562_p2 = scmp.ne.s32.totalorder %s801_s30, %s561_s7  ;;  %p563_p3 = pneg %p807_p0 }
  0x1b   : > { %s566_s16 = scalar_lea.hbm %s1033_s0, 2048  ;;  %p567_p4 = scmp.lt.u32.totalorder %s801_s30, %s1033_s0 }
  0x1c   : > { %p564_p5 = pnand %p563_p3, %p562_p2  ;;  %p568_p7 = scmp.lt.u32.totalorder %s566_s16, %s561_s7 }
  0x1d   : > { %p570_p13 = scmp.lt.u32.totalorder %s561_s7, %s801_s30 }
  0x1e   : > { %p565_p6 = pneg %p564_p5  ;;  %p569_p10 = por %p568_p7, %p567_p4 }
  0x20   : > { %p571_p12 = por %p570_p13, %p569_p10 }
  0x22   : > { %p572_p1 = pnand %p571_p12, %p565_p6 }
  0x24   : > { %575 = shalt.err (!%p572_p1)
}
  0x25   : > { %s576_s20 = scalar_lea.vmem %s803_s4, 1024  ;;  %s709_s26 = smov [#allocation2]  }
  0x26   : > { %p577_p2 = scmp.ne.s32.totalorder %s803_s4, %s576_s20  ;;  %s581_s27 = sshll.u32 %s709_s26, 4  ;;  %s582_s27 = int_to_ptr.vmem [resolvable:$false] %s581_s27 }
  0x27   : > { %s583_s28 = scalar_lea.vmem %s582_s27, 2048  ;;  %p584_p9 = scmp.lt.s32.totalorder %s803_s4, %s582_s27 }
  0x28   : > { %p579_p5 = pnand %p577_p2, %p563_p3  ;;  %p585_p4 = scmp.lt.s32.totalorder %s583_s28, %s576_s20 }
  0x2a   : > { %p580_p11 = pneg %p579_p5  ;;  %p586_p7 = por %p585_p4, %p584_p9 }
  0x2c   : > { %p587_p10 = pnand %p586_p7, %p580_p11 }
  0x2e   : > { %590 = shalt.err (!%p587_p10)
}
  0x2f   : > { %s710_s29 = smov 128   ;;  %s711_s3 = smov 8  }
  0x30   : > { %481 = dma.hbm_to_vmem [thread:$0]  (!%p807_p0), %s801_s30, 1024, %s803_s4, %s136_s6, %s710_s29, %s710_s29, %s711_s3  }
  0x31   : > { %p179_p9 = scmp.lt.s32.totalorder %s707_s14, 3  ;;  %s455_s7 = sshll.u32 %s794_s25, 4 }
  0x32   : > { %s471_s8 = sshll.u32 %s703_s13, 8  ;;  %p1043_p11 = scmp.ge.s32.totalorder %s707_s14, 1 }
  0x33   : > { %s855_s19 = scalar_lea.hbm %s1034_s1, %s471_s8  ;;  %s162_s20 = scalar_lea.vmem [#allocation5], %s455_s7 }
  0x34   : > { %p848_p12 = pnand %p1043_p11, %p179_p9  ;;  %s171_s26 = sshll.u32 %s162_s20, 4  ;;  %s857_s26 = int_to_ptr.vmem [resolvable:$true] %s171_s26 }
  0x35   : > { %s159_s30 = scalar_lea.sflag [#allocation6], %s794_s25  ;;  %s591_s4 = scalar_lea.hbm %s855_s19, 256 }
  0x36   : > { %p592_p1 = scmp.ne.s32.totalorder %s855_s19, %s591_s4  ;;  %s596_s28 = scalar_lea.hbm %s1034_s1, 512 }
  0x37   : > { %p597_p2 = scmp.lt.u32.totalorder %s855_s19, %s1034_s1  ;;  %p598_p5 = scmp.lt.u32.totalorder %s596_s28, %s591_s4 }
  0x38   : > { %p594_p6 = pnand %p592_p1, %p563_p3  ;;  %p600_p7 = scmp.lt.u32.totalorder %s591_s4, %s855_s19 }
  0x39   : > { %p599_p4 = por %p598_p5, %p597_p2 }
  0x3a   : > { %p595_p13 = pneg %p594_p6 }
  0x3b   : > { %p601_p10 = por %p600_p7, %p599_p4 }
  0x3d   : > { %p602_p9 = pnand %p601_p10, %p595_p13 }
  0x3f   : > { %605 = shalt.err (!%p602_p9)
}
  0x40   : > { %s606_s7 = scalar_lea.vmem %s857_s26, 256  ;;  %s712_s18 = smov [#allocation5]  }
  0x41   : > { %p607_p11 = scmp.ne.s32.totalorder %s857_s26, %s606_s7  ;;  %s611_s20 = sshll.u32 %s712_s18, 4  ;;  %s612_s20 = int_to_ptr.vmem [resolvable:$false] %s611_s20 }
  0x42   : > { %s613_s6 = scalar_lea.vmem %s612_s20, 512  ;;  %p614_p8 = scmp.lt.s32.totalorder %s857_s26, %s612_s20 }
  0x43   : > { %p609_p1 = pnand %p607_p11, %p563_p3  ;;  %p615_p2 = scmp.lt.s32.totalorder %s613_s6, %s606_s7 }
  0x45   : > { %p610_p6 = pneg %p609_p1  ;;  %p616_p5 = por %p615_p2, %p614_p8 }
  0x47   : > { %p617_p4 = pnand %p616_p5, %p610_p6 }
  0x49   : > { %620 = shalt.err (!%p617_p4)
}
  0x4a   : > { %484 = dma.hbm_to_vmem [thread:$0]  (!%p807_p0), %s855_s19, 256, %s857_s26, %s159_s30, %s710_s29, %s710_s29, %s711_s3  }
  0x4b   : > { %183 = sbr.rel (%p848_p12) target bundleno = 165 (0xa5), region = 28  ;;  %s891_s4 = sand.u32 (!%p848_p12), 1, %s691_s10  }
  0x4c   : > { %s459_s27 = sshll.u32 (!%p848_p12), %s891_s4, 6  ;;  %s186_s28 = scalar_lea.sflag (!%p848_p12), [#allocation3], %s891_s4 }
  0x4d   : > { %s189_s5 = scalar_lea.vmem (!%p848_p12), [#allocation2], %s459_s27  ;;  %p1045_p8 = scmp.ne.s32.totalorder (!%p848_p12), %s1039_s21, 0 }
  0x52   : > { %674 = dma.done.wait (%p1045_p8), %s186_s28, 1024  }
  0x53   : > { %676 = vsyncadd (%p1045_p8), %s186_s28, 4294966272  ;;  %s460_s25 = sshll.u32 %s891_s4, 4  ;;  %s195_s29 = scalar_lea.sflag [#allocation6], %s891_s4 }
  0x54   : > { %s901_s3 = scalar_lea.vmem [#allocation5], %s460_s25 }
  0x55   : > { %678 = dma.done.wait (%p1045_p8), %s195_s29, 256  }
  0x56   : > { %680 = vsyncadd (%p1045_p8), %s195_s29, 4294967040  ;;  %v907_v0 = vld [vmem:[%s189_s5] sm:$0xff]  ;;  %v909_v1 = vld [vmem:[%s189_s5 + $0x8] sm:$0xff]  ;;  %vm318_vm14 = vcmask 130048   ;;  %s222_s21 = scalar_lea.vmem [#allocation7], %s891_s4  ;;  %s467_s19 = sshll.u32 %s699_s12, 4 }
  0x57   : > { %v911_v2 = vld [vmem:[%s189_s5 + $0x10] sm:$0xff]  ;;  %v913_v3 = vld [vmem:[%s189_s5 + $0x18] sm:$0xff]  ;;  %v917_v5 = vld [vmem:[%s189_s5 + $0x20] sm:$0xff]  ;;  %s344_s15 = sshll.u32 %s222_s21, 4  ;;  %vm328_vm15 = vcmask 122880   ;;  %s986_s8 = scalar_lea.hbm %s1035_s2, %s467_s19  ;;  %s981_s15 = int_to_ptr.vmem [resolvable:$true] %s344_s15 }
  0x58   : > { %v240_v4 = vmax.f32 %v907_v0, %v911_v2  ;;  %v241_v6 = vmax.f32 %v909_v1, %v913_v3  ;;  %v921_v7 = vld [vmem:[%s189_s5 + $0x28] sm:$0xff]  ;;  %v923_v8 = vld [vmem:[%s189_s5 + $0x30] sm:$0xff]  ;;  %v926_v10 = vld [vmem:[%s189_s5 + $0x38] sm:$0xff]  ;;  %s331_s16 = scalar_lea.sflag [#allocation4], %s891_s4  ;;  %s621_s7 = scalar_lea.vmem %s981_s15, 16 }
  0x59   : > { %v225_v30 = vld [vmem:[%s901_s3] sm:$0xff]  ;;  %v226_v31 = vld [vmem:[%s901_s3 + $0x8] sm:$0xff]  ;;  %p622_p0 = scmp.ne.s32.totalorder %s981_s15, %s621_s7  ;;  %p1050_p3 = scmp.ne.s32.totalorder %s1040_s22, 0 }
  0x5a   : > { %v245_v9 = vmax.f32 %v240_v4, %v917_v5  ;;  %v246_v11 = vmax.f32 %v241_v6, %v921_v7  ;;  %vm227_vm0 = vcmp.ge.s32.totalorder %v225_v30, 0  ;;  %vm229_vm1 = vcmp.ne.s32.totalorder %v225_v30, 255  ;;  %s713_s12 = smov [#allocation7]  }
  0x5b   : > { %vm228_vm2 = vcmp.ge.s32.totalorder %v226_v31, 0  ;;  %vm230_vm3 = vcmp.ne.s32.totalorder %v226_v31, 255  ;;  %vm953_vm4 = vmand %vm227_vm0, %vm229_vm1  ;;  %p623_p12 = pnand %p622_p0, %p1050_p3  ;;  %s625_s18 = sshll.u32 %s713_s12, 4  ;;  %s626_s18 = int_to_ptr.vmem [resolvable:$false] %s625_s18 }
  0x5c   : > { %v930_v12 = vmax.f32 %v245_v9, %v923_v8  ;;  %v933_v13 = vmax.f32 %v246_v11, %v926_v10  ;;  %vm957_vm5 = vmand %vm228_vm2, %vm230_vm3  ;;  %v233_v38 = vsel %vm953_vm4, %v225_v30, 0  ;;  %s627_s20 = scalar_lea.vmem %s626_s18, 32  ;;  %p628_p7 = scmp.lt.s32.totalorder %s981_s15, %s626_s18 }
  0x5d   : > { %v234_v41 = vsel %vm957_vm5, %v226_v31, 0  ;;  %vm260_vm6 = vcmp.eq.s32.totalorder %v233_v38, 0  ;;  %vm274_vm7 = vcmp.eq.s32.totalorder %v233_v38, 1  ;;  %vm288_vm10 = vcmp.eq.s32.totalorder %v233_v38, 2  ;;  %p624_p13 = pneg %p623_p12  ;;  %p629_p10 = scmp.lt.s32.totalorder %s627_s20, %s621_s7 }
  0x5e   : > { %v252_v14 = vsub.f32 %v907_v0, %v930_v12  ;;  %v266_v15 = vsub.f32 %v911_v2, %v930_v12  ;;  %v280_v16 = vsub.f32 %v917_v5, %v930_v12  ;;  %v253_v17 = vsub.f32 %v909_v1, %v933_v13 }
  0x5f   : > { %v267_v18 = vsub.f32 %v913_v3, %v933_v13  ;;  %v281_v19 = vsub.f32 %v921_v7, %v933_v13  ;;  %v294_v24 = vsub.f32 %v923_v8, %v930_v12  ;;  %v295_v26 = vsub.f32 %v926_v10, %v933_v13  ;;  %p630_p9 = por %p629_p10, %p628_p7 }
  0x60   : > { %v254_v20 = vmul.f32 1.442695, %v252_v14  ;;  %v268_v21 = vmul.f32 1.442695, %v266_v15  ;;  %v256_v22 = vmul.f32 1.442695, %v253_v17 }
  0x61   : > { %v270_v23 = vmul.f32 1.442695, %v267_v18  ;;  %v282_v25 = vmul.f32 1.442695, %v280_v16  ;;  %v284_v27 = vmul.f32 1.442695, %v281_v19  ;;  %p631_p11 = pnand %p630_p9, %p624_p13 }
  0x62   : > { %541 = vpow2.f32 %v254_v20  ;;  %v296_v28 = vmul.f32 1.442695, %v294_v24  ;;  %v298_v29 = vmul.f32 1.442695, %v295_v26  ;;  %vm261_vm8 = vcmp.eq.s32.totalorder %v234_v41, 0 }
  0x63   : > { %543 = vpow2.f32 %v256_v22  ;;  %vm275_vm9 = vcmp.eq.s32.totalorder %v234_v41, 1  ;;  %v262_v50 = vsel %vm260_vm6, %v907_v0, 0.0  ;;  %v276_v51 = vsel %vm274_vm7, %v911_v2, 0.0 }
  0x64   : > { %545 = vpow2.f32 %v268_v21  ;;  %v263_v52 = vsel %vm261_vm8, %v909_v1, 0.0  ;;  %v277_v53 = vsel %vm275_vm9, %v913_v3, 0.0  ;;  %vm289_vm11 = vcmp.eq.s32.totalorder %v234_v41, 2 }
  0x65   : > { %547 = vpow2.f32 %v270_v23  ;;  %v278_v54 = vadd.f32 %v276_v51, %v262_v50  ;;  %v279_v55 = vadd.f32 %v277_v53, %v263_v52  ;;  %v290_v56 = vsel %vm288_vm10, %v917_v5, 0.0 }
  0x66   : > { %549 = vpow2.f32 %v282_v25  ;;  %v291_v57 = vsel %vm289_vm11, %v921_v7, 0.0  ;;  %vm302_vm12 = vcmp.eq.s32.totalorder %v233_v38, 3  ;;  %vm303_vm13 = vcmp.eq.s32.totalorder %v234_v41, 3 }
  0x67   : > { %551 = vpow2.f32 %v284_v27  ;;  %v292_v58 = vadd.f32 %v290_v56, %v278_v54  ;;  %v293_v59 = vadd.f32 %v291_v57, %v279_v55  ;;  %v304_v60 = vsel %vm302_vm12, %v923_v8, 0.0 }
  0x68   : > { %553 = vpow2.f32 %v296_v28  ;;  %v305_v61 = vsel %vm303_vm13, %v926_v10, 0.0 }
  0x69   : > { %555 = vpow2.f32 %v298_v29  ;;  %v306_v0 = vadd.f32 %v304_v60, %v292_v58  ;;  %v307_v2 = vadd.f32 %v305_v61, %v293_v59 }
  0x6c   : > { %v542_v32 = vpop.eup %541 }
  0x6d   : > { %v544_v34 = vpop.eup %543 }
  0x6e   : > { %v546_v36 = vpop.eup %545 }
  0x6f   : > { %v548_v37 = vpop.eup %547  ;;  %v272_v39 = vadd.f32 %v546_v36, %v542_v32 }
  0x70   : > { %v550_v40 = vpop.eup %549  ;;  %v273_v42 = vadd.f32 %v548_v37, %v544_v34 }
  0x71   : > { %v552_v43 = vpop.eup %551  ;;  %v286_v44 = vadd.f32 %v550_v40, %v272_v39 }
  0x72   : > { %v554_v45 = vpop.eup %553  ;;  %v287_v46 = vadd.f32 %v552_v43, %v273_v42 }
  0x73   : > { %v556_v47 = vpop.eup %555  ;;  %v300_v48 = vadd.f32 %v554_v45, %v286_v44 }
  0x74   : > { %v301_v49 = vadd.f32 %v556_v47, %v287_v46 }
  0x75   : > { %557 = vlog2.f32 %v300_v48 }
  0x76   : > { %559 = vlog2.f32 %v301_v49 }
  0x7f   : > { %v558_v62 = vpop.eup %557 }
  0x80   : > { %v560_v63 = vpop.eup %559  ;;  %v309_v1 = vmul.f32 0.6931472, %v558_v62 }
  0x81   : > { %v311_v3 = vmul.f32 0.6931472, %v560_v63 }
  0x82   : > { %v312_v4 = vadd.f32 %v309_v1, %v930_v12 }
  0x83   : > { %v313_v5 = vadd.f32 %v311_v3, %v933_v13 }
  0x84   : > { %v314_v6 = vsub.f32 %v312_v4, %v306_v0 }
  0x85   : > { %v315_v7 = vsub.f32 %v313_v5, %v307_v2 }
  0x86   : > { %v316_v8 = vsel %vm953_vm4, %v314_v6, 0.0 }
  0x87   : > { %v317_v9 = vsel %vm957_vm5, %v315_v7, 0.0  ;;  %v319_v10 = vsel %vm318_vm14, %v316_v8, 0.0 }
  0x88   : > { %v320_v11 = vsel %vm318_vm14, %v317_v9, 0.0 }
  0x89   : > { %v321_v14 = vadd.f32 %v320_v11, %v319_v10 }
  0x8b   : > { %v322_v15 = vrot.slane %v321_v14, 4 }
  0x8d   : > { %v323_v16 = vadd.f32 %v322_v15, %v321_v14 }
  0x8f   : > { %v324_v12 = vrot.slane %v323_v16, 2 }
  0x91   : > { %v325_v17 = vadd.f32 %v324_v12, %v323_v16 }
  0x93   : > { %v326_v13 = vrot.slane %v325_v17, 1 }
  0x95   : > { %v327_v18 = vadd.f32 %v326_v13, %v325_v17 }
  0x97   : > { %329 = vst.msk [vmem:[%s222_s21] sm:$0x1] %vm328_vm15, %v327_v18 }
  0x98   : > { %634 = shalt.err (!%p631_p11)
}
  0x99   : > { %s635_s6 = scalar_lea.hbm %s986_s8, 16  ;;  %s639_s28 = scalar_lea.hbm %s1035_s2, 32 }
  0x9a   : > { %p636_p1 = scmp.ne.s32.totalorder %s986_s8, %s635_s6  ;;  %p640_p5 = scmp.lt.u32.totalorder %s986_s8, %s1035_s2 }
  0x9b   : > { %p641_p4 = scmp.lt.u32.totalorder %s639_s28, %s635_s6  ;;  %p643_p0 = scmp.lt.u32.totalorder %s635_s6, %s986_s8 }
  0x9c   : > { %p637_p6 = pnand %p636_p1, %p1050_p3 }
  0x9d   : > { %p642_p8 = por %p641_p4, %p640_p5 }
  0x9e   : > { %p638_p2 = pneg %p637_p6 }
  0x9f   : > { %p644_p12 = por %p643_p0, %p642_p8 }
  0xa1   : > { %p645_p13 = pnand %p644_p12, %p638_p2 }
  0xa3   : > { %648 = shalt.err (!%p645_p13)
}
  0xa4   : > { %476 = dma.vmem_to_hbm [thread:$0]  (%p1050_p3), %s981_s15, 16, %s986_s8, %s331_s16  }
  0xa5 PF: > { %s356_s29 = sand.u32 1, %s687_s9   ;;  %p1051_p7 = scmp.ne.s32.totalorder %s1041_s24, 0 }
  0xa6   : > { %p1052_p10 = scmp.ge.s32.totalorder %s707_s14, 2  ;;  %s357_s3 = scalar_lea.sflag [#allocation4], %s356_s29 }
  0xa8   : > { %p486_p9 = pnand %p1052_p10, %p1051_p7 }
  0xaa   : > { %682 = dma.done.wait (!%p486_p9), %s357_s3, 16  }
  0xab   : > { %684 = vsyncadd (!%p486_p9), %s357_s3, 4294967280  ;;  %s21_s14 = sadd.s32 1, %s707_s14   ;;  %s1053_s9 = smov %s691_s10 }
  0xac   : > { %p18_p11 = scmp.ge.s32.totalorder %s21_s14, 4   ;;  %s1054_s10 = smov %s695_s11 }
  0xad   : > { %s1055_s11 = smov %s785_s23  ;;  %s1056_s12 = smov %s703_s13 }
  0xae   : > { %s1057_s13 = smov %s1059_s17  ;;  %20 = sbr.rel (!%p18_p11) target bundleno = 8 (0x8), region = 89 }
  0xb5   :  { %361 = vsyncpa [#allocation3], 1 }
  0xb6   :  { %363 = vsyncpa [#allocation3 + $0x1], 1 }
  0xb7   :  { %364 = vsyncpa [#allocation6], 1 }
  0xb8   :  { %366 = vsyncpa [#allocation6 + $0x1], 1 }
  0xb9   :  { %367 = vsyncpa [#allocation4], 1 }
  0xba   :  { %369 = vsyncpa [#allocation4 + $0x1], 1 }

</bundles_post_ra>
